<compile_context>
chip_gen: v6e
topology: v6e:2x2x1
jax: 0.10.0
libtpu: 0.0.40
codegen_flags: <defaults>
</compile_context>

<pallas_src>
import functools

import jax
import jax.numpy as jnp
from jax import lax
from jax.experimental import pallas as pl
from jax.experimental.pallas import tpu as pltpu


def _round_up(x, m):
    return (x + m - 1) // m * m


def _vmem_capacity_bytes():
    try:
        return int(pltpu.get_tpu_info().vmem_capacity_bytes)
    except Exception:
        return 64 * 1024 * 1024   # conservative default (v7x per-core VMEM)


# ---------------------------------------------------------------------------
# One-time parameter preprocessing (hoisted out of the forward path).
# ---------------------------------------------------------------------------
def prepare_params(emb_w, fc_w, fc_b):
    """Returns (emb_w f32 (V, D) unpadded, fc_w^T lane-padded (D, C_pad), fc_b (1, C_pad))."""
    emb_w = jnp.asarray(emb_w, jnp.float32)
    fc_w = jnp.asarray(fc_w, jnp.float32)
    fc_b = jnp.asarray(fc_b, jnp.float32)
    C, D = fc_w.shape
    C_pad = _round_up(C, 128)
    fcw_t = jnp.zeros((D, C_pad), jnp.float32).at[:, :C].set(fc_w.T)
    fcb = jnp.zeros((1, C_pad), jnp.float32).at[0, :C].set(fc_b)
    return emb_w, fcw_t, fcb


# ---------------------------------------------------------------------------
# Fast path: embedding table resident in VMEM.
# ---------------------------------------------------------------------------
def _emb_bag_fc_vmem_kernel(offsets_ref, text_ref,         # SMEM scalar prefetch
                            emb_ref, fcw_ref, fcb_ref,     # VMEM inputs
                            out_ref,                       # (bag_tile, C_pad)
                            pooled_ref,                    # VMEM scratch (bag_tile, D)
                            *, bag_tile):
    tile = pl.program_id(0)
    D = emb_ref.shape[1]

    def bag_body(b, carry):
        gb = tile * bag_tile + b
        start = offsets_ref[gb]
        end = offsets_ref[gb + 1]
        cnt = end - start

        def tok_body(t, acc):
            tok = text_ref[start + t]
            return acc + emb_ref[pl.ds(tok, 1), :]          # dynamic (1, D) row load

        acc = lax.fori_loop(0, cnt, tok_body,
                            jnp.zeros((1, D), jnp.float32))
        inv = jnp.where(cnt > 0, 1.0 / cnt.astype(jnp.float32), 0.0)
        pooled_ref[pl.ds(b, 1), :] = acc * inv              # empty / padded bag -> zeros
        return carry

    lax.fori_loop(0, bag_tile, bag_body, 0)

    out_ref[...] = (jnp.dot(pooled_ref[...], fcw_ref[...],
                            preferred_element_type=jnp.float32)
                    + fcb_ref[...])


# ---------------------------------------------------------------------------
# Fallback: table in HBM, pipelined per-token row gather (flattened over bags).
# ---------------------------------------------------------------------------
def _emb_bag_fc_hbm_kernel(offsets_ref, text_ref, bagid_ref,   # SMEM scalar prefetch
                           emb_hbm, fcw_ref, fcb_ref,          # emb: HBM (ANY)
                           out_ref,                            # (bag_tile, C_pad)
                           row_buf, sem, pooled_ref,           # scratch
                           *, bag_tile, group, n_slots):
    D = row_buf.shape[1]
    tile = pl.program_id(0)
    tile_start = offsets_ref[tile * bag_tile]
    tile_end = offsets_ref[(tile + 1) * bag_tile]
    n_tok = tile_end - tile_start
    n_groups = (n_tok + (group - 1)) // group

    def token_ids(g):
        """Clamped token ids for group g (SMEM reads only)."""
        ids = []
        for j in range(group):
            t = tile_start + g * group + j
            ids.append(text_ref[jnp.where(t < tile_end, t, tile_start)])
        return ids

    def issue_group(g, slot, ids):
        base = slot * group
        for j in range(group):                              # static unroll -> parallel DMAs
            pltpu.make_async_copy(
                emb_hbm.at[pl.ds(ids[j], 1), :],
                row_buf.at[pl.ds(base + j, 1), :],
                sem.at[base + j],
            ).start()

    def wait_group(slot):
        base = slot * group
        for j in range(group):
            pltpu.make_async_copy(
                emb_hbm.at[pl.ds(0, 1), :],                 # placeholder: same (1, D) shape
                row_buf.at[pl.ds(base + j, 1), :],
                sem.at[base + j],
            ).wait()

    # Scratch persists across grid steps -> zero the per-tile pooled accumulator.
    pooled_ref[...] = jnp.zeros_like(pooled_ref)

    # Prologue: fill the first (n_slots - 1) pipeline stages.
    for p in range(n_slots - 1):
        @pl.when(p < n_groups)
        def _(p=p):
            issue_group(p, p, token_ids(p))

    def g_body(g, carry):
        slot = lax.rem(g, n_slots)

        # All SMEM scalar reads happen BEFORE the DMA wait (wait breaks sst->sld fwd).
        meta = []
        for j in range(group):
            t = tile_start + g * group + j
            valid = t < tile_end
            idx = jnp.where(valid, t, tile_start)
            gbag = bagid_ref[idx]
            cnt = offsets_ref[gbag + 1] - offsets_ref[gbag]
            w = jnp.where(valid, 1.0 / cnt.astype(jnp.float32), 0.0)
            bl = jnp.where(valid, gbag - tile * bag_tile, 0)
            meta.append((bl, w))
        nxt = g + n_slots - 1
        nxt_ids = token_ids(nxt)

        wait_group(slot)

        @pl.when(nxt < n_groups)                            # keep the pipeline full
        def _():
            issue_group(nxt, lax.rem(nxt, n_slots), nxt_ids)

        base = pl.multiple_of(slot * group, group)
        for j in range(group):
            bl, w = meta[j]
            row = row_buf[pl.ds(base + j, 1), :]            # (1, D)
            pooled_ref[pl.ds(bl, 1), :] = pooled_ref[pl.ds(bl, 1), :] + row * w
        return carry

    lax.fori_loop(0, n_groups, g_body, 0)

    out_ref[...] = (jnp.dot(pooled_ref[...], fcw_ref[...],
                            preferred_element_type=jnp.float32)
                    + fcb_ref[...])


# ---------------------------------------------------------------------------
# Forward wrapper.
# ---------------------------------------------------------------------------
@functools.partial(jax.jit, static_argnames=("num_class", "bag_tile", "token_group",
                                             "gather_slots", "force_hbm_gather"))
def text_classification_forward(text, offsets, emb_w, fcw_t, fcb_row, *,
                                num_class, bag_tile=32, token_group=16,
                                gather_slots=3, force_hbm_gather=False):
    """text: int[T] flat token stream; offsets: int[B] bag starts (PyTorch
    EmbeddingBag convention); emb_w/fcw_t/fcb_row from prepare_params()."""
    text = jnp.asarray(text, jnp.int32)
    offsets = jnp.asarray(offsets, jnp.int32)
    T = text.shape[0]
    B = offsets.shape[0]
    V, D = emb_w.shape
    C_pad = fcw_t.shape[1]

    bag_tile = max(8, min(bag_tile, _round_up(B, 8)))
    B_pad = _round_up(B, bag_tile)

    # Bag boundaries: append total length; padded bags are empty (start == end == T).
    offsets_ext = jnp.concatenate(
        [offsets, jnp.full((B_pad + 1 - B,), T, dtype=jnp.int32)])

    table_bytes = V * D * 4
    vmem_cap = _vmem_capacity_bytes()
    use_vmem_table = (not force_hbm_gather) and (table_bytes <= int(vmem_cap * 0.55))

    grid = (B_pad // bag_tile,)
    fcw_spec = pl.BlockSpec((D, C_pad), lambda i, *_: (0, 0))
    fcb_spec = pl.BlockSpec((1, C_pad), lambda i, *_: (0, 0))
    out_spec = pl.BlockSpec((bag_tile, C_pad), lambda i, *_: (i, 0))
    out_shape = jax.ShapeDtypeStruct((B_pad, C_pad), jnp.float32)

    if use_vmem_table:
        grid_spec = pltpu.PrefetchScalarGridSpec(
            num_scalar_prefetch=2, grid=grid,
            in_specs=[pl.BlockSpec((V, D), lambda i, *_: (0, 0)),   # whole table in VMEM
                      fcw_spec, fcb_spec],
            out_specs=out_spec,
            scratch_shapes=[pltpu.VMEM((bag_tile, D), jnp.float32)])
        kernel = functools.partial(_emb_bag_fc_vmem_kernel, bag_tile=bag_tile)
        vmem_limit = int(min(vmem_cap - (4 << 20),
                             max(32 << 20, table_bytes + (16 << 20))))
        out_pad = pl.pallas_call(
            kernel, out_shape=out_shape, grid_spec=grid_spec,
            compiler_params=pltpu.CompilerParams(
                dimension_semantics=("parallel",),
                vmem_limit_bytes=vmem_limit),
        )(offsets_ext, text, emb_w, fcw_t, fcb_row)
    else:
        # bag id per token (tokens of a bag tile are contiguous in `text`).
        bag_of_tok = (jnp.searchsorted(offsets, jnp.arange(T, dtype=jnp.int32),
                                       side='right').astype(jnp.int32) - 1)
        grid_spec = pltpu.PrefetchScalarGridSpec(
            num_scalar_prefetch=3, grid=grid,
            in_specs=[pl.BlockSpec(memory_space=pl.ANY),            # table stays in HBM
                      fcw_spec, fcb_spec],
            out_specs=out_spec,
            scratch_shapes=[
                pltpu.VMEM((gather_slots * token_group, D), jnp.float32),
                pltpu.SemaphoreType.DMA((gather_slots * token_group,)),
                pltpu.VMEM((bag_tile, D), jnp.float32)])
        kernel = functools.partial(_emb_bag_fc_hbm_kernel, bag_tile=bag_tile,
                                   group=token_group, n_slots=gather_slots)
        out_pad = pl.pallas_call(
            kernel, out_shape=out_shape, grid_spec=grid_spec,
            compiler_params=pltpu.CompilerParams(
                dimension_semantics=("parallel",)),
        )(offsets_ext, text, bag_of_tok, emb_w, fcw_t, fcb_row)

    return out_pad[:B, :num_class]


# ---------------------------------------------------------------------------
# Plain-JAX reference (nn.EmbeddingBag(mean) + nn.Linear).
# ---------------------------------------------------------------------------
def _reference_forward(text, offsets, emb_w, fc_w, fc_b):
    total = text.shape[0]
    offs_ext = list(jax.device_get(offsets)) + [total]
    pooled = []
    for b in range(offsets.shape[0]):
        s, e = int(offs_ext[b]), int(offs_ext[b + 1])
        if e > s:
            pooled.append(jnp.mean(emb_w[text[s:e]], axis=0))
        else:
            pooled.append(jnp.zeros((emb_w.shape[1],), jnp.float32))
    pooled = jnp.stack(pooled)
    return pooled @ fc_w.T + fc_b


if __name__ == "__main__":
    # Small shapes consistent with the module's forward.
    vocab_size, embed_dim, num_class = 64, 32, 8
    total_tokens = 20

    key = jax.random.PRNGKey(0)
    k_emb, k_fcw, k_text = jax.random.split(key, 3)

    # init_weights(): uniform(-0.5, 0.5) for embedding & fc weight, zero bias.
    initrange = 0.5
    emb_w = jax.random.uniform(k_emb, (vocab_size, embed_dim),
                               jnp.float32, -initrange, initrange)
    fc_w = jax.random.uniform(k_fcw, (num_class, embed_dim),
                              jnp.float32, -initrange, initrange)
    fc_b = jnp.zeros((num_class,), jnp.float32)

    # Flat token stream + bag offsets (includes an empty bag to exercise that path).
    text = jax.random.randint(k_text, (total_tokens,), 0, vocab_size,
                              dtype=jnp.int32)
    offsets = jnp.array([0, 5, 5, 14], dtype=jnp.int32)    # 4 bags over 20 tokens

    emb_p, fcw_t, fcb_row = prepare_params(emb_w, fc_w, fc_b)   # one-time layout prep

    # Fast path (table fits in VMEM at these shapes).
    out_fast = text_classification_forward(text, offsets, emb_p, fcw_t, fcb_row,
                                           num_class=num_class)
    out_fast = jax.block_until_ready(out_fast)

    # Force the HBM DMA-gather path as well, to validate the big-vocab fallback.
    out_hbm = text_classification_forward(text, offsets, emb_p, fcw_t, fcb_row,
                                          num_class=num_class, force_hbm_gather=True)
    out_hbm = jax.block_until_ready(out_hbm)

    ref = _reference_forward(text, offsets, emb_w, fc_w, fc_b)
    ok_fast = bool(jnp.allclose(out_fast, ref, atol=1e-5, rtol=1e-5))
    ok_hbm = bool(jnp.allclose(out_hbm, ref, atol=1e-5, rtol=1e-5))
    if not ok_fast:
        raise AssertionError("VMEM fast-path output mismatch vs JAX reference")
    if not ok_hbm:
        raise AssertionError("HBM gather-path output mismatch vs JAX reference")

    print("KERNEL_OK")
</pallas_src>

<mosaic_0001>
module attributes {stable_mosaic.version = 11 : i64} {
  func.func @_emb_bag_fc_vmem_kernel(%arg0: i32, %arg1: memref<9xi32, #tpu.memory_space<smem>>, %arg2: memref<20xi32, #tpu.memory_space<smem>>, %arg3: memref<64x32xf32, #tpu.memory_space<vmem>>, %arg4: memref<32x128xf32, #tpu.memory_space<vmem>>, %arg5: memref<1x128xf32, #tpu.memory_space<vmem>>, %arg6: memref<8x128xf32, #tpu.memory_space<vmem>>, %arg7: memref<8x32xf32, #tpu.memory_space<vmem>>) attributes {dimension_semantics = [#tpu.dimension_semantics<parallel>], iteration_bounds = array<i64: 1>, scalar_prefetch = 2 : i64, scratch_operands = 1 : i64, tpu.core_type = #tpu.core_type<tc>, window_params = [{pipeline_mode = #tpu.pipeline_mode<synchronous>, transform_indices = @transform_0, window_bounds = array<i64: 64, 32>}, {pipeline_mode = #tpu.pipeline_mode<synchronous>, transform_indices = @transform_1, window_bounds = array<i64: 32, 128>}, {pipeline_mode = #tpu.pipeline_mode<synchronous>, transform_indices = @transform_2, window_bounds = array<i64: 1, 128>}, {transform_indices = @transform_3, window_bounds = array<i64: 8, 128>}]} {
    %c0_i32 = arith.constant 0 : i32
    %c8_i32 = arith.constant 8 : i32
    %0 = arith.addi %c0_i32, %c8_i32 : i32
    %c1_i32 = arith.constant 1 : i32
    scf.for %arg8 = %c0_i32 to %0 step %c1_i32  : i32 {
      %c8_i32_8 = arith.constant 8 : i32
      %8 = arith.muli %arg0, %c8_i32_8 : i32
      %9 = arith.addi %8, %arg8 : i32
      %10 = arith.index_cast %9 : i32 to index
      %11 = memref.load %arg1[%10] : memref<9xi32, #tpu.memory_space<smem>>
      %c1_i32_9 = arith.constant 1 : i32
      %12 = arith.addi %9, %c1_i32_9 : i32
      %13 = arith.index_cast %12 : i32 to index
      %14 = memref.load %arg1[%13] : memref<9xi32, #tpu.memory_space<smem>>
      %15 = arith.subi %14, %11 : i32
      %cst_10 = arith.constant 0.000000e+00 : f32
      %16 = vector.broadcast %cst_10 : f32 to vector<1x32xf32>
      %c0_i32_11 = arith.constant 0 : i32
      %17 = arith.subi %15, %c0_i32_11 : i32
      %18 = arith.addi %c0_i32_11, %17 : i32
      %c1_i32_12 = arith.constant 1 : i32
      %19 = scf.for %arg9 = %c0_i32_11 to %18 step %c1_i32_12 iter_args(%arg10 = %16) -> (vector<1x32xf32>)  : i32 {
        %28 = arith.addi %11, %arg9 : i32
        %29 = arith.index_cast %28 : i32 to index
        %30 = memref.load %arg2[%29] : memref<20xi32, #tpu.memory_space<smem>>
        %31 = arith.index_cast %30 : i32 to index
        %c0_17 = arith.constant 0 : index
        %32 = vector.load %arg3[%31, %c0_17] : memref<64x32xf32, #tpu.memory_space<vmem>>, vector<1x32xf32>
        %33 = arith.addf %arg10, %32 : vector<1x32xf32>
        scf.yield %33 : vector<1x32xf32>
      }
      %c0_i32_13 = arith.constant 0 : i32
      %20 = arith.cmpi sgt, %15, %c0_i32_13 : i32
      %21 = arith.sitofp %15 : i32 to f32
      %cst_14 = arith.constant 1.000000e+00 : f32
      %22 = arith.divf %cst_14, %21 : f32
      %cst_15 = arith.constant 0.000000e+00 : f32
      %23 = arith.select %20, %22, %cst_15 : f32
      %24 = vector.broadcast %23 : f32 to vector<1x32xf32>
      %25 = arith.mulf %19, %24 : vector<1x32xf32>
      %26 = arith.index_cast %arg8 : i32 to index
      %c0_16 = arith.constant 0 : index
      %27 = vector.load %arg7[%26, %c0_16] : memref<8x32xf32, #tpu.memory_space<vmem>>, vector<1x32xf32>
      tpu.vector_store %arg7[%26, %c0_16], %25 {strides = array<i32>} : memref<8x32xf32, #tpu.memory_space<vmem>>, vector<1x32xf32>,
    }
    %c8_i32_0 = arith.constant 8 : i32
    %c0 = arith.constant 0 : index
    %c0_1 = arith.constant 0 : index
    %1 = vector.load %arg7[%c0, %c0_1] : memref<8x32xf32, #tpu.memory_space<vmem>>, vector<8x32xf32>
    %c0_2 = arith.constant 0 : index
    %c0_3 = arith.constant 0 : index
    %2 = vector.load %arg4[%c0_2, %c0_3] : memref<32x128xf32, #tpu.memory_space<vmem>>, vector<32x128xf32>
    %cst = arith.constant dense<0.000000e+00> : vector<8x128xf32>
    %3 = tpu.matmul %1, %2, %cst {dimension_numbers = #tpu.dot_dimension_numbers<[1], [0], [0], [1], [0, 0, 1, 1], [], []>} : vector<8x32xf32>, vector<32x128xf32>, vector<8x128xf32> -> vector<8x128xf32>
    %c0_4 = arith.constant 0 : index
    %c0_5 = arith.constant 0 : index
    %4 = vector.load %arg5[%c0_4, %c0_5] : memref<1x128xf32, #tpu.memory_space<vmem>>, vector<1x128xf32>
    %5 = vector.broadcast %4 : vector<1x128xf32> to vector<8x128xf32>
    %6 = arith.addf %3, %5 : vector<8x128xf32>
    %c0_6 = arith.constant 0 : index
    %c0_7 = arith.constant 0 : index
    %7 = vector.load %arg6[%c0_6, %c0_7] : memref<8x128xf32, #tpu.memory_space<vmem>>, vector<8x128xf32>
    tpu.vector_store %arg6[%c0_6, %c0_7], %6 {strides = array<i32>} : memref<8x128xf32, #tpu.memory_space<vmem>>, vector<8x128xf32>,
    return
  }
  func.func @transform_0(%arg0: i32, %arg1: memref<9xi32, #tpu.memory_space<smem>>, %arg2: memref<20xi32, #tpu.memory_space<smem>>) -> (i32, i32) {
    %c0_i32 = arith.constant 0 : i32
    %c0_i32_0 = arith.constant 0 : i32
    %c0_i32_1 = arith.constant 0 : i32
    return %c0_i32, %c0_i32_0 : i32, i32
  }
  func.func @transform_1(%arg0: i32, %arg1: memref<9xi32, #tpu.memory_space<smem>>, %arg2: memref<20xi32, #tpu.memory_space<smem>>) -> (i32, i32) {
    %c0_i32 = arith.constant 0 : i32
    %c0_i32_0 = arith.constant 0 : i32
    %c0_i32_1 = arith.constant 0 : i32
    return %c0_i32, %c0_i32_0 : i32, i32
  }
  func.func @transform_2(%arg0: i32, %arg1: memref<9xi32, #tpu.memory_space<smem>>, %arg2: memref<20xi32, #tpu.memory_space<smem>>) -> (i32, i32) {
    %c0_i32 = arith.constant 0 : i32
    %c0_i32_0 = arith.constant 0 : i32
    %c0_i32_1 = arith.constant 0 : i32
    return %c0_i32, %c0_i32_0 : i32, i32
  }
  func.func @transform_3(%arg0: i32, %arg1: memref<9xi32, #tpu.memory_space<smem>>, %arg2: memref<20xi32, #tpu.memory_space<smem>>) -> (i32, i32) {
    %c0_i32 = arith.constant 0 : i32
    %c0_i32_0 = arith.constant 0 : i32
    return %arg0, %c0_i32 : i32, i32
  }
}

</mosaic_0001>

<bundles_post_ra>
// kernel: text_classification_forward.1
= control target key start
LH: loop header
LB: loop body
LE: loop exit
PB: predicated region body
PF: predicated region fallthrough
CT: control target
= control target key end

     0   :  { %s366_s0 = inlined_call_operand.vmem [shape: s32[9], index: 0, kind: input, shape index: {}]   ;;  %s367_s2 = inlined_call_operand.vmem [shape: f32[64,32], index: 2, kind: input, shape index: {}]   ;;  %s368_s3 = inlined_call_operand.vmem [shape: f32[32,128], index: 3, kind: input, shape index: {}]   ;;  %s369_s4 = inlined_call_operand.vmem [shape: f32[1,128], index: 4, kind: input, shape index: {}]   ;;  %s370_s5 = inlined_call_operand.vmem [shape: f32[8,128], index: 5, kind: output, shape index: {}]   ;;  %s371_s1 = inlined_call_operand.vmem [shape: s32[20], index: 1, kind: input, shape index: {}]  }
   0x1   :  { %s10_s20 = sshll.u32 %s366_s0, 4  ;;  %s14_s23 = sshll.u32 %s371_s1, 4  ;;  %s11_s20 = int_to_ptr.vmem [resolvable:$true] %s10_s20  ;;  %s15_s23 = int_to_ptr.vmem [resolvable:$true] %s14_s23 }
   0x2   :  { %s226_s24 = scalar_lea.vmem %s11_s20, 16  ;;  %p231_p1 = scmp.lt.s32.totalorder %s11_s20, %s11_s20 }
   0x3   :  { %p227_p0 = scmp.ne.s32.totalorder %s11_s20, %s226_s24  ;;  %p232_p2 = scmp.lt.s32.totalorder %s226_s24, %s226_s24 }
   0x5   :  { %p233_p3 = por %p232_p2, %p231_p1 }
   0x7   :  { %p234_p4 = pnand %p233_p3, %p227_p0 }
   0x9   :  { %237 = shalt.err (!%p234_p4)  }
   0xa   :  { %s284_s25 = smov [#allocation4]   ;;  %s238_s26 = scalar_lea.vmem %s15_s23, 16 }
   0xb   :  { %13 = dma.vmem_to_smem %s11_s20, 16, %s284_s25, [#allocation3] }
   0xc   :  { %p239_p5 = scmp.ne.s32.totalorder %s15_s23, %s238_s26  ;;  %p243_p6 = scmp.lt.s32.totalorder %s15_s23, %s15_s23 }
   0xd   :  { %p244_p7 = scmp.lt.s32.totalorder %s238_s26, %s238_s26 }
   0xf   :  { %p245_p8 = por %p244_p7, %p243_p6 }
  0x11   :  { %p246_p9 = pnand %p245_p8, %p239_p5 }
  0x13   :  { %249 = shalt.err (!%p246_p9)  }
  0x14   :  { %s285_s0 = smov [#allocation5]  }
  0x15   :  { %17 = dma.vmem_to_smem %s15_s23, 16, %s285_s0, [#allocation3] }
  0x16   :  { %266 = dma.done.wait [#allocation3], 32 }
  0x17   :  { %267 = vsyncadd [#allocation3], 4294967264 }
  0x18   :  { %19 = sfence }
  0x19   :  { %s324_s1 = smov 0  }
  0x1a LB: > { %s34_s27 = sld [smem:[#allocation4 + %s270_s1]]  ;;  %s331_s28 = sadd.s32 1, %s270_s1   ;;  %v280_v0 = vmov 0.0   ;;  %s270_s1 = sphi %s324_s1, %s372_s1  }
  0x1b   : > { %s36_s29 = sld [smem:[#allocation4 + %s331_s28]] }
  0x21   : > { %s334_s30 = ssub.s32 %s36_s29, %s34_s27 }
  0x22   : > { %p167_p10 = scmp.le.s32.totalorder %s334_s30, 0 }
  0x23   : > { %s276_s6 = smov (!%p167_p10), 0  }
  0x24   : > { %157 = sbr.rel (%p167_p10) target bundleno = 54 (0x36), region = 42 }
  0x29   : > { %v272_v1 = vmov 0.0  }
  0x2a LB: >> { %s45_s7 = sadd.s32 %s278_s6, %s34_s27  ;;  %s41_s6 = sadd.s32 1, %s278_s6   ;;  %s278_s6 = sphi %s276_s6, %s41_s6   ;;  %v274_v1 = vphi %v272_v1, %v273_v1  }
  0x2b   : >> { %s46_s8 = sld [smem:[#allocation5 + %s45_s7]]  ;;  %p40_p11 = scmp.ge.s32.totalorder %s41_s6, %s334_s30 }
  0x31   : >> { %s47_s11 = scalar_lea.vmem %s367_s2, %s46_s8  ;;  %43 = sbr.rel (!%p40_p11) target bundleno = 42 (0x2a), region = 48 }
  0x32   : >> { %v48_v2 = vld [vmem:[%s47_s11] sm:$0x1] }
  0x33   : >> { %v49_v3 = vadd.f32 %v274_v1, %v48_v2  }
  0x35   : >> { %v273_v1 = vmov %v49_v3   ;;  %v281_v0 = vmov (%p40_p11), %v49_v3  }
  0x36 PF: > { %s51_s12 = scvt.s32.f32 %s334_s30  ;;  %p50_p12 = scmp.gt.s32.totalorder %s334_s30, 0  ;;  %vm59_vm0 = vcmask 253952   ;;  %v282_v0 = vphi %v280_v0, %v281_v0  }
  0x37   : > { %s58_s14 = scalar_lea.vmem [#allocation2], %s270_s1  ;;  %p28_p13 = scmp.ge.s32.totalorder %s331_s28, 8  }
  0x38   : > { %v52_v4 = vstv %s51_s12  ;;  %s372_s1 = smov %s331_s28  ;;  %v65_v8 = vld [vmem:[%s368_s3 + $0x18] sm:$0xff] (%p28_p13)  ;;  %v286_v9 = vmov (%p28_p13), 0.0   ;;  %v64_v10 = vld [vmem:[%s368_s3 + $0x10] sm:$0xff] (%p28_p13)  ;;  %vm287_vm1 = vmmov (%p28_p13), 0   ;;  %v63_v11 = vld [vmem:[%s368_s3 + $0x8] sm:$0xff] (%p28_p13)  ;;  %vm73_vm2 = vcmask (%p28_p13), 261120  }
  0x39   : > { %224 = vrcp.f32 %v52_v4  ;;  %175 = vmatprep.subr.mxu0 (%p28_p13), %v286_v9  ;;  %183 = vmatprep.mubr.msk.f32.mxu0 (%p28_p13), %vm287_vm1, %v286_v9  ;;  %v62_v12 = vld [vmem:[%s368_s3] sm:$0xff] (%p28_p13) }
  0x3a   :  { %176 = vmatpush3.msra.mxu0 (%p28_p13), %v65_v8  ;;  %v168_v14 = vld [vmem:[%s369_s4] ss:$0 sm:$0xff] (%p28_p13) }
  0x3b   :  { %177 = vmatprep.subr.mxu0 (%p28_p13), %v286_v9 }
  0x3c   :  { %178 = vmatpush3.msra.mxu0 (%p28_p13), %v64_v10 }
  0x3d   :  { %179 = vmatprep.subr.mxu0 (%p28_p13), %v286_v9 }
  0x3e   :  { %180 = vmatpush3.msra.mxu0 (%p28_p13), %v63_v11 }
  0x3f   :  { %181 = vmatprep.subr.mxu0 (%p28_p13), %v286_v9 }
  0x40   :  { %182 = vmatpush3.msra.mxu0 (%p28_p13), %v62_v12 }
  0x46   : > { %v225_v5 = vpop.eup %224 }
  0x47   : > { %186 = vpush %v225_v5 }
  0x78   : > { %s187_s13 = spop %186 }
  0x79   : > { %s374_s13 = smov (!%p50_p12, %s187_s13), 0.0  ;;  %30 = sbr.rel (!%p28_p13) target bundleno = 26 (0x1a), region = 59 }
  0x7a   : > { %v56_v6 = vstv %s374_s13 }
  0x7b   : > { %v57_v7 = vmul.f32 %v282_v0, %v56_v6 }
  0x7d   : > { %60 = vst.msk [vmem:[%s58_s14] sm:$0x1] %vm59_vm0, %v57_v7 }
  0x84   :  { %v61_v13 = vld [vmem:[#allocation2] sm:$0xff] }
  0x85   :  { %184 = vmatmul.mubr.msk.f32.vlgmr.msra.gmra.mxu0 %vm73_vm2, %v61_v13 }
 0x145   :  { %v143_v15 = vpop.f32.mrf.mxu0 }
 0x146   :  { %v144_v16 = vadd.f32 %v168_v14, %v143_v15 }
 0x147   :  { %v185_v17 = vpop.f32.mrf.mxu0 }
 0x148   :  { %147 = vst [vmem:[%s370_s5] sm:$0xff] %v144_v16 }

</bundles_post_ra>
